<compile_context>
chip_gen: v5e
topology: v5e:2x2
jax: 0.10.0
libtpu: 0.0.40
codegen_flags: <defaults>
</compile_context>

<pallas_src>
import functools
import math

import jax
import jax.numpy as jnp
from jax.experimental import pallas as pl
from jax.experimental.pallas import tpu as pltpu

_BN_EPS = 1e-5
_TM = 512            # M tile for gridded matmuls / convs (multiple of 8, MXU friendly)
_LANE = 128


def _round_up(x, m):
    return (x + m - 1) // m * m


def _cdiv(a, b):
    return (a + b - 1) // b


@functools.lru_cache(maxsize=1)
def _vmem_physical_bytes():
    # Generation switch: v5e/v6e have 128 MiB of VMEM per core, v7x has 64 MiB.
    try:
        info = pltpu.get_tpu_info()
        cap = getattr(info, "vmem_capacity_bytes", None) or getattr(info, "vmem_bytes", None)
        if cap:
            return int(cap)
    except Exception:
        pass
    return 64 * 1024 * 1024      # conservative (v7x) default


def _cparams(dims, est_bytes):
    ceiling = int(0.75 * _vmem_physical_bytes())          # ~96 MiB v5e/v6e, ~48 MiB v7x
    limit = int(min(ceiling, max(32 * 1024 * 1024, est_bytes)))
    return pltpu.CompilerParams(dimension_semantics=dims, vmem_limit_bytes=limit)


# ----------------------------- Pallas kernels -----------------------------

def _mm_kernel(x_ref, w_ref, b_ref, o_ref, *, relu):
    acc = jnp.dot(x_ref[...], w_ref[...], preferred_element_type=jnp.float32)
    acc = acc + b_ref[...]
    if relu:
        acc = jnp.maximum(acc, 0.0)
    o_ref[...] = acc.astype(o_ref.dtype)


def _mm_res_relu_kernel(x_ref, w_ref, b_ref, r_ref, o_ref):
    acc = jnp.dot(x_ref[...], w_ref[...], preferred_element_type=jnp.float32)
    acc = acc + b_ref[...] + r_ref[...].astype(jnp.float32)
    o_ref[...] = jnp.maximum(acc, 0.0).astype(o_ref.dtype)


def _conv3x3_kernel(x_ref, w_ref, b_ref, o_ref, *, tm, offsets, stride):
    # x_ref : (R, cin)      whole zero-padded image (flattened rows), VMEM-resident
    # w_ref : (9, cin, cout) folded conv weight, VMEM-resident
    # b_ref : (1, cout)     folded BN bias
    # o_ref : (tm, cout)    tile of "full padded-width" output rows
    base = pl.multiple_of(stride * pl.program_id(1) * tm, 8)
    acc = None
    for t, off in enumerate(offsets):          # 9 taps: (strided) row-shifted windows
        if stride == 1:
            tap = x_ref[pl.ds(base + off, tm), :]          # bf16, straight from the ref
        else:
            tap = x_ref[pl.ds(base + off, tm, stride=stride), :]
        d = jnp.dot(tap, w_ref[t], preferred_element_type=jnp.float32)
        acc = d if acc is None else acc + d
    acc = jnp.maximum(acc + b_ref[...], 0.0)   # folded BN bias + ReLU epilogue
    o_ref[...] = acc.astype(o_ref.dtype)


def _maxpool3x3s2_kernel(x_ref, o_ref, *, tm, offsets):
    # x_ref : (R, C) whole (-inf padded) image, flattened rows, VMEM-resident
    # o_ref : (tm, C) tile of "full padded-width" pooled rows
    base = pl.multiple_of(2 * pl.program_id(1) * tm, 8)
    m = x_ref[pl.ds(base + offsets[0], tm, stride=2), :]
    for off in offsets[1:]:
        m = jnp.maximum(m, x_ref[pl.ds(base + off, tm, stride=2), :])
    o_ref[...] = m


def _gap_embed_kernel(x_ref, w_ref, b_ref, o_ref, *, inv_hw):
    # Fused global-average-pool + embed Linear (+ folded BatchNorm1d).
    # x_ref: (HW, C) bf16, w_ref: (C, N) bf16, b_ref: (1, N) f32, o_ref: (1, N) f32
    s = jnp.sum(x_ref[...].astype(jnp.float32), axis=0, keepdims=True) * inv_hw
    acc = jnp.dot(s.astype(jnp.bfloat16), w_ref[...], preferred_element_type=jnp.float32)
    o_ref[...] = (acc + b_ref[...]).astype(o_ref.dtype)


# ----------------------------- gridded matmul wrapper -----------------------------

def _matmul(xm, wm, bias, residual=None, *, relu=False, out_dtype=jnp.bfloat16):
    """(M, K) @ (K, N) + bias [+ residual] [+ ReLU]; bf16 MXU inputs, f32 accumulate."""
    m, k = xm.shape
    k2, n = wm.shape
    assert k == k2
    tm = _TM if m >= _TM else _round_up(max(m, 1), 8)
    mp = _round_up(m, tm)

    xm = xm.astype(jnp.bfloat16)
    wm = wm.astype(jnp.bfloat16)
    if mp != m:
        xm = jnp.pad(xm, ((0, mp - m), (0, 0)))
    bias = bias.reshape(1, n).astype(jnp.float32)

    args = [xm, wm, bias]
    in_specs = [
        pl.BlockSpec((tm, k), lambda r: (r, 0)),
        pl.BlockSpec((k, n), lambda r: (0, 0)),     # weight stays VMEM-resident
        pl.BlockSpec((1, n), lambda r: (0, 0)),
    ]
    if residual is not None:
        res = residual.astype(jnp.bfloat16)
        if mp != m:
            res = jnp.pad(res, ((0, mp - m), (0, 0)))
        args.append(res)
        in_specs.append(pl.BlockSpec((tm, n), lambda r: (r, 0)))
        kernel = _mm_res_relu_kernel
    else:
        kernel = functools.partial(_mm_kernel, relu=relu)

    res_b = tm * n * 2 if residual is not None else 0
    est = 2 * (tm * k * 2 + tm * n * 4 + res_b) + k * n * 2 + n * 4 + 8 * 1024 * 1024
    out = pl.pallas_call(
        kernel,
        out_shape=jax.ShapeDtypeStruct((mp, n), out_dtype),
        grid=(mp // tm,),
        in_specs=in_specs,
        out_specs=pl.BlockSpec((tm, n), lambda r: (r, 0)),
        compiler_params=_cparams(("parallel",), est),
        cost_estimate=pl.CostEstimate(
            flops=2 * mp * k * n,
            transcendentals=0,
            bytes_accessed=mp * k * 2 + k * n * 2 + mp * n * 2),
    )(*args)
    return out[:m] if mp != m else out


# ----------------------------- conv / pool wrappers -----------------------------

def _pad_flat(x, wp, r_need, pad_value):
    """Pad NHWC by 1 (top/left), to width wp on the right, and enough bottom rows that
    flat-row reads below r_need never go out of bounds; flatten spatial rows."""
    n, h, w, c = x.shape
    h_tot = max(_cdiv(r_need, wp), h + 2)
    xp = jnp.pad(x, ((0, 0), (1, h_tot - h - 1), (1, wp - w - 1), (0, 0)),
                 constant_values=pad_value)
    return xp.reshape(n, h_tot * wp, c)


def _extract_patches(x, kh, kw, stride, pad):
    n, h, w, c = x.shape
    xp = jnp.pad(x, ((0, 0), (pad, pad), (pad, pad), (0, 0)))
    oh = (h + 2 * pad - kh) // stride + 1
    ow = (w + 2 * pad - kw) // stride + 1
    cols = []
    for i in range(kh):
        for j in range(kw):
            cols.append(xp[:, i:i + stride * (oh - 1) + 1:stride,
                           j:j + stride * (ow - 1) + 1:stride, :])
    return jnp.concatenate(cols, axis=-1), oh, ow


@functools.partial(jax.jit, static_argnames=("kh", "kw", "stride", "pad", "relu"))
def _conv_im2col(x, wgt, bias, *, kh, kw, stride, pad, relu):
    """im2col conv -- used only for conv1 (7x7/s2, cin=3, ~2% of network FLOPs)."""
    n = x.shape[0]
    cin = x.shape[-1]
    cout = wgt.shape[-1]
    patches, oh, ow = _extract_patches(x, kh, kw, stride, pad)
    k = kh * kw * cin
    xm = patches.reshape(n * oh * ow, k)
    wm = wgt.reshape(k, cout)
    if k % _LANE:                                 # pad K for MXU feed alignment (147 -> 256)
        kp = _round_up(k, _LANE)
        xm = jnp.pad(xm, ((0, 0), (0, kp - k)))
        wm = jnp.pad(wm, ((0, kp - k), (0, 0)))
    y = _matmul(xm, wm, bias, relu=relu)
    return y.reshape(n, oh, ow, cout)


@functools.partial(jax.jit, static_argnames=("stride", "relu"))
def _conv1x1(x, wgt, bias, residual=None, *, stride=1, relu=True):
    """1x1 conv (optionally strided), bias = folded eval-mode BN, optional residual+ReLU."""
    if stride != 1:
        x = x[:, ::stride, ::stride, :]
    n, oh, ow, cin = x.shape
    cout = wgt.shape[-1]
    xm = x.reshape(n * oh * ow, cin)
    wm = wgt.reshape(cin, cout)
    rm = residual.reshape(n * oh * ow, cout) if residual is not None else None
    y = _matmul(xm, wm, bias, rm, relu=relu)
    return y.reshape(n, oh, ow, cout)


@functools.partial(jax.jit, static_argnames=("stride",))
def _conv3x3(x, wgt, bias, *, stride=1):
    """3x3 pad-1 conv (+folded BN bias + ReLU), stride 1 or 2, without HBM im2col.

    The zero-padded image is VMEM-resident per batch element; each of the 9 taps is a
    (stride-strided) row-shifted window accumulated on the MXU in-kernel.  Output is
    computed at full padded width wp and sliced back outside."""
    n, h, w_sp, cin = x.shape
    cout = wgt.shape[-1]
    oh = (h - 1) // stride + 1
    ow = (w_sp - 1) // stride + 1
    wp = _round_up(w_sp + 2, 8)                       # sublane-aligned padded width
    m_full = oh * wp
    tm = _TM if m_full >= _TM else _round_up(m_full, 8)
    n_tiles = _cdiv(m_full, tm)
    r_need = stride * (n_tiles * tm - 1) + 2 * wp + 3
    xflat = _pad_flat(x.astype(jnp.bfloat16), wp, r_need, 0.0)
    r_pad = xflat.shape[1]

    offsets = tuple(i * wp + j for i in range(3) for j in range(3))
    wr = wgt.reshape(9, cin, cout).astype(jnp.bfloat16)
    br = bias.reshape(1, cout).astype(jnp.float32)

    kernel = functools.partial(_conv3x3_kernel, tm=tm, offsets=offsets, stride=stride)
    est = (2 * r_pad * cin * 2 + 9 * cin * cout * 2 + 2 * tm * cout * 2
           + tm * cout * 4 + 8 * 1024 * 1024)
    y = pl.pallas_call(
        kernel,
        out_shape=jax.ShapeDtypeStruct((n, n_tiles * tm, cout), jnp.bfloat16),
        grid=(n, n_tiles),
        in_specs=[
            pl.BlockSpec((None, r_pad, cin), lambda b, r: (b, 0, 0)),
            pl.BlockSpec((9, cin, cout), lambda b, r: (0, 0, 0)),
            pl.BlockSpec((1, cout), lambda b, r: (0, 0)),
        ],
        out_specs=pl.BlockSpec((None, tm, cout), lambda b, r: (b, r, 0)),
        compiler_params=_cparams(("parallel", "parallel"), est),
        cost_estimate=pl.CostEstimate(
            flops=2 * n * n_tiles * tm * 9 * cin * cout,
            transcendentals=0,
            bytes_accessed=n * r_pad * cin * 2 + 9 * cin * cout * 2
                           + n * n_tiles * tm * cout * 2),
    )(xflat, wr, br)
    y = y[:, :m_full, :].reshape(n, oh, wp, cout)[:, :, :ow, :]
    return y


@jax.jit
def maxpool3x3s2(x):
    """3x3 / stride-2 / pad-1 max pool, computed in-kernel from a single padded activation
    (stride-2 row windows of the VMEM-resident image; no 9x HBM staging)."""
    n, h, w_sp, c = x.shape
    oh = (h - 1) // 2 + 1
    ow = (w_sp - 1) // 2 + 1
    wp = _round_up(w_sp + 2, 8)
    m_full = oh * wp
    tm = _TM if m_full >= _TM else _round_up(m_full, 8)
    n_tiles = _cdiv(m_full, tm)
    r_need = 2 * (n_tiles * tm - 1) + 2 * wp + 3
    neg = float(jnp.finfo(jnp.bfloat16).min)
    xflat = _pad_flat(x.astype(jnp.bfloat16), wp, r_need, neg)
    r_pad = xflat.shape[1]

    offsets = tuple(i * wp + j for i in range(3) for j in range(3))
    kernel = functools.partial(_maxpool3x3s2_kernel, tm=tm, offsets=offsets)
    est = 2 * r_pad * c * 2 + 4 * tm * c * 2 + 8 * 1024 * 1024
    y = pl.pallas_call(
        kernel,
        out_shape=jax.ShapeDtypeStruct((n, n_tiles * tm, c), jnp.bfloat16),
        grid=(n, n_tiles),
        in_specs=[pl.BlockSpec((None, r_pad, c), lambda b, r: (b, 0, 0))],
        out_specs=pl.BlockSpec((None, tm, c), lambda b, r: (b, r, 0)),
        compiler_params=_cparams(("parallel", "parallel"), est),
    )(xflat)
    y = y[:, :m_full, :].reshape(n, oh, wp, c)[:, :, :ow, :]
    return y


@jax.jit
def gap_embed(x, wgt, bias):
    """Fused global average pool + embed Linear (+ folded BatchNorm1d)."""
    n, h, w_sp, c = x.shape
    hw = h * w_sp
    npad = wgt.shape[-1]
    xr = x.astype(jnp.bfloat16).reshape(n, hw, c)
    kernel = functools.partial(_gap_embed_kernel, inv_hw=1.0 / hw)
    est = 2 * hw * c * 2 + c * npad * 2 + npad * 8 + 8 * 1024 * 1024
    y = pl.pallas_call(
        kernel,
        out_shape=jax.ShapeDtypeStruct((n, 1, npad), jnp.float32),
        grid=(n,),
        in_specs=[
            pl.BlockSpec((None, hw, c), lambda b: (b, 0, 0)),
            pl.BlockSpec((c, npad), lambda b: (0, 0)),
            pl.BlockSpec((1, npad), lambda b: (0, 0)),
        ],
        out_specs=pl.BlockSpec((None, 1, npad), lambda b: (b, 0, 0)),
        compiler_params=_cparams(("parallel",), est),
    )(xr, wgt.astype(jnp.bfloat16), bias.reshape(1, npad).astype(jnp.float32))
    return y.reshape(n, npad)


# ----------------------------- Synthetic deterministic parameters -----------------------------

class _ParamGen:
    def __init__(self, seed):
        self._key = jax.random.PRNGKey(seed)
        self._i = 0

    def key(self):
        self._i += 1
        return jax.random.fold_in(self._key, self._i)


def _conv_bn_folded(gen, kh, kw, cin, cout):
    """Conv weight (HWIO) with its eval-mode BatchNorm folded into (w_bf16, bias_f32)."""
    fan_in = kh * kw * cin
    w = jax.random.normal(gen.key(), (kh, kw, cin, cout), jnp.float32) / math.sqrt(fan_in)
    gamma = 1.0 + 0.1 * jax.random.normal(gen.key(), (cout,), jnp.float32)
    beta = 0.05 * jax.random.normal(gen.key(), (cout,), jnp.float32)
    mean = 0.05 * jax.random.normal(gen.key(), (cout,), jnp.float32)
    var = jax.random.uniform(gen.key(), (cout,), jnp.float32, minval=0.8, maxval=1.2)
    scale = gamma / jnp.sqrt(var + _BN_EPS)
    return (w * scale).astype(jnp.bfloat16), (beta - mean * scale).astype(jnp.float32)


def init_encoder_params(embed_size, seed=0):
    gen = _ParamGen(seed)
    params = {"conv1": _conv_bn_folded(gen, 7, 7, 3, 64)}
    inplanes = 64
    layers = []
    # resnet152 bottleneck config: blocks = [3, 8, 36, 3]
    for planes, nblocks, stride in ((64, 3, 1), (128, 8, 2), (256, 36, 2), (512, 3, 2)):
        blocks = []
        for bi in range(nblocks):
            s = stride if bi == 0 else 1
            blk = {
                "s": s,
                "conv1": _conv_bn_folded(gen, 1, 1, inplanes, planes),
                "conv2": _conv_bn_folded(gen, 3, 3, planes, planes),
                "conv3": _conv_bn_folded(gen, 1, 1, planes, planes * 4),
            }
            if s != 1 or inplanes != planes * 4:
                blk["down"] = _conv_bn_folded(gen, 1, 1, inplanes, planes * 4)
            blocks.append(blk)
            inplanes = planes * 4
        layers.append(blocks)
    params["layers"] = layers

    # embed Linear + BatchNorm1d folded together; cout padded to a full 128-lane slab.
    fc_in = 512 * 4  # resnet152.fc.in_features == 2048
    embed_pad = _round_up(embed_size, _LANE)
    w = jax.random.normal(gen.key(), (fc_in, embed_size), jnp.float32) / math.sqrt(fc_in)
    b = 0.05 * jax.random.normal(gen.key(), (embed_size,), jnp.float32)
    gamma = 1.0 + 0.1 * jax.random.normal(gen.key(), (embed_size,), jnp.float32)
    beta = 0.05 * jax.random.normal(gen.key(), (embed_size,), jnp.float32)
    mean = 0.05 * jax.random.normal(gen.key(), (embed_size,), jnp.float32)
    var = jax.random.uniform(gen.key(), (embed_size,), jnp.float32, minval=0.8, maxval=1.2)
    scale = gamma / jnp.sqrt(var + _BN_EPS)
    w_f = w * scale
    b_f = (b - mean) * scale + beta
    params["embed_w"] = jnp.pad(w_f, ((0, 0), (0, embed_pad - embed_size))).astype(jnp.bfloat16)
    params["embed_b"] = jnp.pad(b_f, (0, embed_pad - embed_size)).astype(jnp.float32)
    params["embed_size"] = embed_size
    return params


# ----------------------------- Forward pass (EncoderCNN.forward) -----------------------------

def encoder_cnn_forward(params, images):
    """images: (B, 3, H, W) NCHW float32 (PyTorch convention). Returns (B, embed_size) f32."""
    x = jnp.transpose(images, (0, 2, 3, 1)).astype(jnp.bfloat16)       # NCHW -> NHWC, bf16
    w, b = params["conv1"]
    # TODO(synk): conv1 (7x7/s2, cin=3) keeps an XLA im2col stage: direct windowing would give
    #             49 MXU pushes of K=3 per tile (severe under-utilisation) for ~2% of FLOPs.
    x = _conv_im2col(x, w, b, kh=7, kw=7, stride=2, pad=3, relu=True)   # conv1 + bn1 + relu
    x = maxpool3x3s2(x)                                                  # in-kernel maxpool
    for blocks in params["layers"]:                                      # layer1..layer4
        for blk in blocks:
            s = blk["s"]
            identity = x
            out = _conv1x1(x, *blk["conv1"], stride=1, relu=True)
            out = _conv3x3(out, *blk["conv2"], stride=s)                 # direct windowed conv
            if "down" in blk:
                identity = _conv1x1(x, *blk["down"], stride=s, relu=False)
            # conv3 + bn3 + residual add + relu fused in one gridded matmul kernel
            x = _conv1x1(out, *blk["conv3"], identity, stride=1, relu=True)
    feats = gap_embed(x, params["embed_w"], params["embed_b"])           # GAP + Linear + BN1d
    return feats[:, :params["embed_size"]]


if __name__ == "__main__":
    embed_size = 32
    params = init_encoder_params(embed_size, seed=0)
    images = jax.random.normal(jax.random.PRNGKey(0), (2, 3, 16, 16), jnp.float32)  # NCHW
    feats = encoder_cnn_forward(params, images)
    feats = jax.block_until_ready(feats)
    assert feats.shape == (2, embed_size), feats.shape
    assert bool(jnp.all(jnp.isfinite(feats)))
    print("KERNEL_OK")
</pallas_src>

<mosaic_0001>
module attributes {stable_mosaic.version = 11 : i64} {
  func.func @_mm_kernel(%arg0: i32, %arg1: memref<128x256xbf16, #tpu.memory_space<vmem>>, %arg2: memref<256x64xbf16, #tpu.memory_space<vmem>>, %arg3: memref<1x64xf32, #tpu.memory_space<vmem>>, %arg4: memref<128x64xbf16, #tpu.memory_space<vmem>>) attributes {dimension_semantics = [#tpu.dimension_semantics<parallel>], iteration_bounds = array<i64: 1>, scalar_prefetch = 0 : i64, scratch_operands = 0 : i64, tpu.core_type = #tpu.core_type<tc>, window_params = [{transform_indices = @transform_0, window_bounds = array<i64: 128, 256>}, {pipeline_mode = #tpu.pipeline_mode<synchronous>, transform_indices = @transform_1, window_bounds = array<i64: 256, 64>}, {pipeline_mode = #tpu.pipeline_mode<synchronous>, transform_indices = @transform_2, window_bounds = array<i64: 1, 64>}, {transform_indices = @transform_3, window_bounds = array<i64: 128, 64>}]} {
    %c0 = arith.constant 0 : index
    %c0_0 = arith.constant 0 : index
    %0 = vector.load %arg1[%c0, %c0_0] : memref<128x256xbf16, #tpu.memory_space<vmem>>, vector<128x256xbf16>
    %c0_1 = arith.constant 0 : index
    %c0_2 = arith.constant 0 : index
    %1 = vector.load %arg2[%c0_1, %c0_2] : memref<256x64xbf16, #tpu.memory_space<vmem>>, vector<256x64xbf16>
    %cst = arith.constant dense<0.000000e+00> : vector<128x64xf32>
    %2 = tpu.matmul %0, %1, %cst {dimension_numbers = #tpu.dot_dimension_numbers<[1], [0], [0], [1], [0, 0, 1, 1], [], []>} : vector<128x256xbf16>, vector<256x64xbf16>, vector<128x64xf32> -> vector<128x64xf32>
    %c0_3 = arith.constant 0 : index
    %c0_4 = arith.constant 0 : index
    %3 = vector.load %arg3[%c0_3, %c0_4] : memref<1x64xf32, #tpu.memory_space<vmem>>, vector<1x64xf32>
    %4 = vector.broadcast %3 : vector<1x64xf32> to vector<128x64xf32>
    %5 = arith.addf %2, %4 : vector<128x64xf32>
    %cst_5 = arith.constant 0.000000e+00 : f32
    %6 = vector.broadcast %cst_5 : f32 to vector<128x64xf32>
    %7 = arith.maximumf %5, %6 : vector<128x64xf32>
    %8 = arith.truncf %7 : vector<128x64xf32> to vector<128x64xbf16>
    %c0_6 = arith.constant 0 : index
    %c0_7 = arith.constant 0 : index
    %9 = vector.load %arg4[%c0_6, %c0_7] : memref<128x64xbf16, #tpu.memory_space<vmem>>, vector<128x64xbf16>
    tpu.vector_store %arg4[%c0_6, %c0_7], %8 {strides = array<i32>} : memref<128x64xbf16, #tpu.memory_space<vmem>>, vector<128x64xbf16>,
    return
  }
  func.func @transform_0(%arg0: i32) -> (i32, i32) {
    %c0_i32 = arith.constant 0 : i32
    %c0_i32_0 = arith.constant 0 : i32
    return %arg0, %c0_i32 : i32, i32
  }
  func.func @transform_1(%arg0: i32) -> (i32, i32) {
    %c0_i32 = arith.constant 0 : i32
    %c0_i32_0 = arith.constant 0 : i32
    %c0_i32_1 = arith.constant 0 : i32
    return %c0_i32, %c0_i32_0 : i32, i32
  }
  func.func @transform_2(%arg0: i32) -> (i32, i32) {
    %c0_i32 = arith.constant 0 : i32
    %c0_i32_0 = arith.constant 0 : i32
    %c0_i32_1 = arith.constant 0 : i32
    return %c0_i32, %c0_i32_0 : i32, i32
  }
  func.func @transform_3(%arg0: i32) -> (i32, i32) {
    %c0_i32 = arith.constant 0 : i32
    %c0_i32_0 = arith.constant 0 : i32
    return %arg0, %c0_i32 : i32, i32
  }
}

</mosaic_0001>

<bundles_post_ra>
// kernel: _conv_im2col.1
= control target key start
LH: loop header
LB: loop body
LE: loop exit
PB: predicated region body
PF: predicated region fallthrough
CT: control target
= control target key end

     0   :  { %s821_s0 = inlined_call_operand.vmem [shape: bf16[128,256], index: 0, kind: input, shape index: {}]   ;;  %s822_s1 = inlined_call_operand.vmem [shape: bf16[256,64], index: 1, kind: input, shape index: {}]   ;;  %s823_s2 = inlined_call_operand.vmem [shape: f32[1,64], index: 2, kind: input, shape index: {}]   ;;  %s824_s3 = inlined_call_operand.hbm [shape: bf16[128,64], index: 3, kind: output, shape index: {}]  }
   0x1   :  { %v559_v0 = vld [vmem:[%s822_s1 + $0x38] sm:$0xff]  ;;  %v558_v2 = vld [vmem:[%s822_s1 + $0x30] sm:$0xff]  ;;  %v557_v4 = vld [vmem:[%s822_s1 + $0x28] sm:$0xff] }
   0x2   :  { %v567_v1 = vld [vmem:[%s822_s1 + $0x78] sm:$0xff]  ;;  %243 = vmatpush.bf16.msra.mxu0 %v559_v0  ;;  %568 = vmatpush.bf16.msra.mxu2 %v559_v0  ;;  %v566_v3 = vld [vmem:[%s822_s1 + $0x70] sm:$0xff]  ;;  %v565_v5 = vld [vmem:[%s822_s1 + $0x68] sm:$0xff] }
   0x3   :  { %292 = vmatpush.bf16.msra.mxu1 %v567_v1  ;;  %576 = vmatpush.bf16.msra.mxu3 %v567_v1 }
   0x6   :  { %244 = vmatpush.bf16.msra.mxu0 %v558_v2  ;;  %569 = vmatpush.bf16.msra.mxu2 %v558_v2 }
   0x7   :  { %293 = vmatpush.bf16.msra.mxu1 %v566_v3  ;;  %577 = vmatpush.bf16.msra.mxu3 %v566_v3 }
   0x8   :  { %8 = vsyncpa [#allocation3], 0  ;;  %v556_v6 = vld [vmem:[%s822_s1 + $0x20] sm:$0xff]  ;;  %v555_v8 = vld [vmem:[%s822_s1 + $0x18] sm:$0xff]  ;;  %vm373_vm0 = vcmask 519168   ;;  %s396_s28 = sshll.u32 %s824_s3, 4  ;;  %s397_s28 = int_to_ptr.hbm [resolvable:$true] %s396_s28 }
   0x9   :  { %v564_v7 = vld [vmem:[%s822_s1 + $0x60] sm:$0xff]  ;;  %v563_v9 = vld [vmem:[%s822_s1 + $0x58] sm:$0xff]  ;;  %v554_v10 = vld [vmem:[%s822_s1 + $0x10] sm:$0xff]  ;;  %s615_s29 = smov 64   ;;  %s616_s30 = smov 4  }
   0xa   :  { %245 = vmatpush.bf16.msra.mxu0 %v557_v4  ;;  %570 = vmatpush.bf16.msra.mxu2 %v557_v4  ;;  %v562_v11 = vld [vmem:[%s822_s1 + $0x50] sm:$0xff]  ;;  %v553_v12 = vld [vmem:[%s822_s1 + $0x8] sm:$0xff]  ;;  %v552_v14 = vld [vmem:[%s822_s1] sm:$0xff] }
   0xb   :  { %294 = vmatpush.bf16.msra.mxu1 %v565_v5  ;;  %578 = vmatpush.bf16.msra.mxu3 %v565_v5  ;;  %v561_v13 = vld [vmem:[%s822_s1 + $0x48] sm:$0xff]  ;;  %v560_v15 = vld [vmem:[%s822_s1 + $0x40] sm:$0xff]  ;;  %v418_v28 = vld [vmem:[%s821_s0 + $0x10] sm:$0xf] }
   0xc   :  { %v410_v16 = vld [vmem:[%s821_s0] sm:$0xf]  ;;  %v537_v17 = vld [vmem:[%s821_s0 + $0x4] sm:$0xf0]  ;;  %v536_v20 = vld [vmem:[%s821_s0 + $0x4] sm:$0xf] }
   0xd   :  { %v442_v18 = vld [vmem:[%s821_s0 + $0x40] sm:$0xf]  ;;  %v545_v19 = vld [vmem:[%s821_s0 + $0x44] sm:$0xf0]  ;;  %v412_v21 = vld [vmem:[%s821_s0 + $0x8] sm:$0xf0]  ;;  %v411_v24 = vor.u32 %v537_v17, %v410_v16 }
   0xe   :  { %246 = vmatpush.bf16.msra.mxu0 %v556_v6  ;;  %571 = vmatpush.bf16.msra.mxu2 %v556_v6  ;;  %v544_v22 = vld [vmem:[%s821_s0 + $0x44] sm:$0xf]  ;;  %v444_v23 = vld [vmem:[%s821_s0 + $0x48] sm:$0xf0]  ;;  %v443_v25 = vor.u32 %v545_v19, %v442_v18  ;;  %v415_v26 = vor.u32 %v536_v20, %v412_v21  ;;  %v539_v29 = vld [vmem:[%s821_s0 + $0x14] sm:$0xf0] }
   0xf   :  { %295 = vmatpush.bf16.msra.mxu1 %v564_v7  ;;  %579 = vmatpush.bf16.msra.mxu3 %v564_v7  ;;  %v447_v27 = vor.u32 %v544_v22, %v444_v23  ;;  %v450_v30 = vld [vmem:[%s821_s0 + $0x50] sm:$0xf]  ;;  %v547_v31 = vld [vmem:[%s821_s0 + $0x54] sm:$0xf0]  ;;  %v538_v32 = vld [vmem:[%s821_s0 + $0x14] sm:$0xf]  ;;  %v419_v36 = vor.u32 %v539_v29, %v418_v28 }
  0x10   :  { %v420_v33 = vld [vmem:[%s821_s0 + $0x18] sm:$0xf0]  ;;  %v546_v34 = vld [vmem:[%s821_s0 + $0x54] sm:$0xf]  ;;  %v451_v37 = vor.u32 %v547_v31, %v450_v30  ;;  %v426_v40 = vld [vmem:[%s821_s0 + $0x20] sm:$0xf] }
  0x11   :  { %v452_v35 = vld [vmem:[%s821_s0 + $0x58] sm:$0xf0]  ;;  %v423_v38 = vor.u32 %v538_v32, %v420_v33  ;;  %v541_v41 = vld [vmem:[%s821_s0 + $0x24] sm:$0xf0]  ;;  %v458_v42 = vld [vmem:[%s821_s0 + $0x60] sm:$0xf] }
  0x12   :  { %247 = vmatpush.bf16.msra.mxu0 %v555_v8  ;;  %572 = vmatpush.bf16.msra.mxu2 %v555_v8  ;;  %v455_v39 = vor.u32 %v546_v34, %v452_v35  ;;  %v549_v43 = vld [vmem:[%s821_s0 + $0x64] sm:$0xf0]  ;;  %v540_v44 = vld [vmem:[%s821_s0 + $0x24] sm:$0xf]  ;;  %v428_v45 = vld [vmem:[%s821_s0 + $0x28] sm:$0xf0]  ;;  %v427_v48 = vor.u32 %v541_v41, %v426_v40 }
  0x13   :  { %296 = vmatpush.bf16.msra.mxu1 %v563_v9  ;;  %580 = vmatpush.bf16.msra.mxu3 %v563_v9  ;;  %v548_v46 = vld [vmem:[%s821_s0 + $0x64] sm:$0xf]  ;;  %v460_v47 = vld [vmem:[%s821_s0 + $0x68] sm:$0xf0]  ;;  %v459_v49 = vor.u32 %v549_v43, %v458_v42  ;;  %v431_v50 = vor.u32 %v540_v44, %v428_v45  ;;  %v434_v52 = vld [vmem:[%s821_s0 + $0x30] sm:$0xf] }
  0x14   :  { %v463_v51 = vor.u32 %v548_v46, %v460_v47  ;;  %v543_v53 = vld [vmem:[%s821_s0 + $0x34] sm:$0xf0]  ;;  %v466_v54 = vld [vmem:[%s821_s0 + $0x70] sm:$0xf]  ;;  %v542_v56 = vld [vmem:[%s821_s0 + $0x34] sm:$0xf] }
  0x15   :  { %v551_v55 = vld [vmem:[%s821_s0 + $0x74] sm:$0xf0]  ;;  %v436_v57 = vld [vmem:[%s821_s0 + $0x38] sm:$0xf0]  ;;  %v550_v58 = vld [vmem:[%s821_s0 + $0x74] sm:$0xf]  ;;  %v435_v60 = vor.u32 %v543_v53, %v434_v52 }
  0x16   :  { %248 = vmatpush.bf16.msra.mxu0 %v554_v10  ;;  %573 = vmatpush.bf16.msra.mxu2 %v554_v10  ;;  %v468_v59 = vld [vmem:[%s821_s0 + $0x78] sm:$0xf0]  ;;  %v467_v61 = vor.u32 %v551_v55, %v466_v54  ;;  %v439_v62 = vor.u32 %v542_v56, %v436_v57  ;;  %v784_v0 = vld [vmem:[%s823_s2] ss:$0 sm:$0xff]  ;;  %s614_s0 = smov [#allocation2]  }
  0x17   :  { %297 = vmatpush.bf16.msra.mxu1 %v562_v11  ;;  %581 = vmatpush.bf16.msra.mxu3 %v562_v11  ;;  %v471_v63 = vor.u32 %v550_v58, %v468_v59  ;;  %s394_s2 = sshll.u32 %s614_s0, 4  ;;  %s395_s2 = int_to_ptr.vmem [resolvable:$true] %s394_s2 }
  0x1a   :  { %249 = vmatpush.bf16.msra.mxu0 %v553_v12  ;;  %574 = vmatpush.bf16.msra.mxu2 %v553_v12 }
  0x1b   :  { %298 = vmatpush.bf16.msra.mxu1 %v561_v13  ;;  %582 = vmatpush.bf16.msra.mxu3 %v561_v13 }
  0x1e   :  { %250 = vmatpush.bf16.msra.mxu0 %v552_v14  ;;  %575 = vmatpush.bf16.msra.mxu2 %v552_v14 }
  0x1f   :  { %299 = vmatpush.bf16.msra.mxu1 %v560_v15  ;;  %583 = vmatpush.bf16.msra.mxu3 %v560_v15 }
  0x21   :  { %251 = vmatmul.bf16.vlgmr.msra.gmra.mxu0 %v411_v24  ;;  %271 = vmatmul.bf16.vlgmr.msra.gmra.mxu2 %v443_v25 }
  0x22   :  { %300 = vmatmul.bf16.vlgmr.msra.gmra.mxu1 %v415_v26  ;;  %320 = vmatmul.bf16.vlgmr.msra.gmra.mxu3 %v447_v27 }
  0x31   :  { %256 = vmatmul.bf16.gmra.mxu0 %v419_v36  ;;  %276 = vmatmul.bf16.gmra.mxu2 %v451_v37 }
  0x32   :  { %305 = vmatmul.bf16.gmra.mxu1 %v423_v38  ;;  %325 = vmatmul.bf16.gmra.mxu3 %v455_v39 }
  0x41   :  { %261 = vmatmul.bf16.gmra.mxu0 %v427_v48  ;;  %281 = vmatmul.bf16.gmra.mxu2 %v459_v49 }
  0x42   :  { %310 = vmatmul.bf16.gmra.mxu1 %v431_v50  ;;  %330 = vmatmul.bf16.gmra.mxu3 %v463_v51 }
  0x51   :  { %266 = vmatmul.bf16.gmra.mxu0 %v435_v60  ;;  %286 = vmatmul.bf16.gmra.mxu2 %v467_v61 }
  0x52   :  { %315 = vmatmul.bf16.gmra.mxu1 %v439_v62  ;;  %335 = vmatmul.bf16.gmra.mxu3 %v471_v63 }
  0x9e   :  { %v252_v1 = vpop.f32.mrf.mxu0 }
  0x9f   :  { %v253_v2 = vadd.f32 %v784_v0, %v252_v1  ;;  %v301_v3 = vpop.f32.mrf.mxu1 }
  0xa1   :  { %v302_v4 = vadd.f32 %v301_v3, %v253_v2 }
  0xa3   :  { %v341_v5 = vmax.f32 %v302_v4, 0.0 }
  0xa4   :  { %v272_v6 = vpop.f32.mrf.mxu2 }
  0xa5   :  { %v357_v7 = vpack.c.bf16 %v341_v5, %v341_v5  ;;  %v273_v8 = vadd.f32 %v784_v0, %v272_v6  ;;  %v321_v9 = vpop.f32.mrf.mxu3 }
  0xa6   :  { %v254_v10 = vpop.f32.mrf.mxu0 }
  0xa7   :  { %374 = vst.msk [vmem:[#allocation2] sm:$0xf] %vm373_vm0, %v357_v7  ;;  %v322_v11 = vadd.f32 %v321_v9, %v273_v8  ;;  %v255_v12 = vadd.f32 %v784_v0, %v254_v10  ;;  %v303_v13 = vpop.f32.mrf.mxu1 }
  0xa9   :  { %v349_v14 = vmax.f32 %v322_v11, 0.0  ;;  %v304_v15 = vadd.f32 %v303_v13, %v255_v12 }
  0xab   :  { %v365_v16 = vpack.c.bf16 %v349_v14, %v349_v14  ;;  %v342_v17 = vmax.f32 %v304_v15, 0.0 }
  0xac   :  { %v274_v18 = vpop.f32.mrf.mxu2 }
  0xad   :  { %382 = vst.msk [vmem:[#allocation2 + $0x20] sm:$0xf] %vm373_vm0, %v365_v16  ;;  %v358_v19 = vpack.c.bf16 %v342_v17, %v342_v17  ;;  %v275_v20 = vadd.f32 %v784_v0, %v274_v18  ;;  %v323_v21 = vpop.f32.mrf.mxu3 }
  0xae   :  { %v257_v22 = vpop.f32.mrf.mxu0 }
  0xaf   :  { %375 = vst.msk [vmem:[#allocation2 + $0x4] sm:$0xf] %vm373_vm0, %v358_v19  ;;  %v324_v23 = vadd.f32 %v323_v21, %v275_v20  ;;  %v258_v24 = vadd.f32 %v784_v0, %v257_v22  ;;  %v306_v25 = vpop.f32.mrf.mxu1 }
  0xb1   :  { %v350_v26 = vmax.f32 %v324_v23, 0.0  ;;  %v307_v27 = vadd.f32 %v306_v25, %v258_v24 }
  0xb3   :  { %v366_v28 = vpack.c.bf16 %v350_v26, %v350_v26  ;;  %v343_v29 = vmax.f32 %v307_v27, 0.0 }
  0xb4   :  { %v277_v30 = vpop.f32.mrf.mxu2 }
  0xb5   :  { %383 = vst.msk [vmem:[#allocation2 + $0x24] sm:$0xf] %vm373_vm0, %v366_v28  ;;  %v359_v31 = vpack.c.bf16 %v343_v29, %v343_v29  ;;  %v278_v32 = vadd.f32 %v784_v0, %v277_v30  ;;  %v326_v33 = vpop.f32.mrf.mxu3 }
  0xb6   :  { %v259_v34 = vpop.f32.mrf.mxu0 }
  0xb7   :  { %376 = vst.msk [vmem:[#allocation2 + $0x8] sm:$0xf] %vm373_vm0, %v359_v31  ;;  %v327_v35 = vadd.f32 %v326_v33, %v278_v32  ;;  %v260_v36 = vadd.f32 %v784_v0, %v259_v34  ;;  %v308_v37 = vpop.f32.mrf.mxu1 }
  0xb9   :  { %v351_v38 = vmax.f32 %v327_v35, 0.0  ;;  %v309_v39 = vadd.f32 %v308_v37, %v260_v36 }
  0xbb   :  { %v367_v40 = vpack.c.bf16 %v351_v38, %v351_v38  ;;  %v344_v41 = vmax.f32 %v309_v39, 0.0 }
  0xbc   :  { %v279_v42 = vpop.f32.mrf.mxu2 }
  0xbd   :  { %384 = vst.msk [vmem:[#allocation2 + $0x28] sm:$0xf] %vm373_vm0, %v367_v40  ;;  %v360_v43 = vpack.c.bf16 %v344_v41, %v344_v41  ;;  %v280_v44 = vadd.f32 %v784_v0, %v279_v42  ;;  %v328_v45 = vpop.f32.mrf.mxu3 }
  0xbe   :  { %v262_v46 = vpop.f32.mrf.mxu0 }
  0xbf   :  { %377 = vst.msk [vmem:[#allocation2 + $0xc] sm:$0xf] %vm373_vm0, %v360_v43  ;;  %v329_v47 = vadd.f32 %v328_v45, %v280_v44  ;;  %v263_v48 = vadd.f32 %v784_v0, %v262_v46  ;;  %v311_v49 = vpop.f32.mrf.mxu1 }
  0xc1   :  { %v352_v50 = vmax.f32 %v329_v47, 0.0  ;;  %v312_v51 = vadd.f32 %v311_v49, %v263_v48 }
  0xc3   :  { %v368_v52 = vpack.c.bf16 %v352_v50, %v352_v50  ;;  %v345_v53 = vmax.f32 %v312_v51, 0.0 }
  0xc4   :  { %v282_v54 = vpop.f32.mrf.mxu2 }
  0xc5   :  { %385 = vst.msk [vmem:[#allocation2 + $0x2c] sm:$0xf] %vm373_vm0, %v368_v52  ;;  %v361_v55 = vpack.c.bf16 %v345_v53, %v345_v53  ;;  %v283_v56 = vadd.f32 %v784_v0, %v282_v54  ;;  %v331_v57 = vpop.f32.mrf.mxu3 }
  0xc6   :  { %v264_v58 = vpop.f32.mrf.mxu0 }
  0xc7   :  { %378 = vst.msk [vmem:[#allocation2 + $0x10] sm:$0xf] %vm373_vm0, %v361_v55  ;;  %v332_v59 = vadd.f32 %v331_v57, %v283_v56  ;;  %v265_v60 = vadd.f32 %v784_v0, %v264_v58  ;;  %v313_v61 = vpop.f32.mrf.mxu1 }
  0xc9   :  { %v353_v62 = vmax.f32 %v332_v59, 0.0  ;;  %v314_v63 = vadd.f32 %v313_v61, %v265_v60 }
  0xcb   :  { %v369_v1 = vpack.c.bf16 %v353_v62, %v353_v62  ;;  %v346_v2 = vmax.f32 %v314_v63, 0.0 }
  0xcc   :  { %v284_v3 = vpop.f32.mrf.mxu2 }
  0xcd   :  { %386 = vst.msk [vmem:[#allocation2 + $0x30] sm:$0xf] %vm373_vm0, %v369_v1  ;;  %v362_v4 = vpack.c.bf16 %v346_v2, %v346_v2  ;;  %v285_v5 = vadd.f32 %v784_v0, %v284_v3  ;;  %v333_v6 = vpop.f32.mrf.mxu3 }
  0xce   :  { %v267_v7 = vpop.f32.mrf.mxu0 }
  0xcf   :  { %379 = vst.msk [vmem:[#allocation2 + $0x14] sm:$0xf] %vm373_vm0, %v362_v4  ;;  %v334_v8 = vadd.f32 %v333_v6, %v285_v5  ;;  %v268_v9 = vadd.f32 %v784_v0, %v267_v7  ;;  %v316_v10 = vpop.f32.mrf.mxu1 }
  0xd1   :  { %v354_v11 = vmax.f32 %v334_v8, 0.0  ;;  %v317_v12 = vadd.f32 %v316_v10, %v268_v9 }
  0xd3   :  { %v370_v13 = vpack.c.bf16 %v354_v11, %v354_v11  ;;  %v347_v14 = vmax.f32 %v317_v12, 0.0 }
  0xd4   :  { %v287_v15 = vpop.f32.mrf.mxu2 }
  0xd5   :  { %387 = vst.msk [vmem:[#allocation2 + $0x34] sm:$0xf] %vm373_vm0, %v370_v13  ;;  %v363_v16 = vpack.c.bf16 %v347_v14, %v347_v14  ;;  %v288_v17 = vadd.f32 %v784_v0, %v287_v15  ;;  %v336_v18 = vpop.f32.mrf.mxu3 }
  0xd6   :  { %v269_v19 = vpop.f32.mrf.mxu0 }
  0xd7   :  { %380 = vst.msk [vmem:[#allocation2 + $0x18] sm:$0xf] %vm373_vm0, %v363_v16  ;;  %v337_v20 = vadd.f32 %v336_v18, %v288_v17  ;;  %v270_v21 = vadd.f32 %v784_v0, %v269_v19  ;;  %v318_v22 = vpop.f32.mrf.mxu1 }
  0xd9   :  { %v355_v23 = vmax.f32 %v337_v20, 0.0  ;;  %v319_v24 = vadd.f32 %v318_v22, %v270_v21 }
  0xdb   :  { %v371_v25 = vpack.c.bf16 %v355_v23, %v355_v23  ;;  %v348_v26 = vmax.f32 %v319_v24, 0.0 }
  0xdc   :  { %v289_v27 = vpop.f32.mrf.mxu2 }
  0xdd   :  { %388 = vst.msk [vmem:[#allocation2 + $0x38] sm:$0xf] %vm373_vm0, %v371_v25  ;;  %v364_v28 = vpack.c.bf16 %v348_v26, %v348_v26  ;;  %v290_v29 = vadd.f32 %v784_v0, %v289_v27  ;;  %v338_v30 = vpop.f32.mrf.mxu3 }
  0xdf   :  { %381 = vst.msk [vmem:[#allocation2 + $0x1c] sm:$0xf] %vm373_vm0, %v364_v28  ;;  %v339_v31 = vadd.f32 %v338_v30, %v290_v29 }
  0xe1   :  { %v356_v32 = vmax.f32 %v339_v31, 0.0 }
  0xe3   :  { %v372_v33 = vpack.c.bf16 %v356_v32, %v356_v32 }
  0xe5   :  { %389 = vst.msk [vmem:[#allocation2 + $0x3c] sm:$0xf] %vm373_vm0, %v372_v33 }
  0xe6   :  { %402 = dma.vmem_to_hbm [thread:$0]  %s395_s2, 1024, %s397_s28, [#allocation3], %s615_s29, %s615_s29, %s616_s30  }
  0xe7   :  { %612 = dma.done.wait [#allocation3], 1024  }
  0xe8   :  { %613 = vsyncadd [#allocation3], 4294966272 }
  0xe9   :  { %407 = vsyncpa [#allocation3], 1 }

</bundles_post_ra>
